<compile_context>
chip_gen: v7x
topology: tpu7x:2x2x1
jax: 0.10.0
libtpu: 0.0.40
codegen_flags: <defaults>
</compile_context>

<pallas_src>
import functools

import jax
import jax.numpy as jnp
from jax.experimental import pallas as pl
from jax.experimental.pallas import tpu as pltpu


def _round_up(x, m):
    return ((x + m - 1) // m) * m


def _diag_gaussian_kernel(x_ref, w_ref, b_ref, mean_ref):
    # mean = x @ W + b   (MXU matmul, f32 accumulate; bias row broadcast on VPU)
    mean = jnp.dot(x_ref[...], w_ref[...], preferred_element_type=jnp.float32)
    mean_ref[...] = (mean + b_ref[...]).astype(mean_ref.dtype)


@functools.partial(jax.jit, static_argnames=("block_batch",))
def diag_gaussian_forward(x, weight_t, bias, logstd, *, block_batch=512):
    """Returns (mean, std_row):
         mean    : (batch, out_dim)
         std_row : (1, out_dim)  -- exp(logstd); broadcasts lazily against mean.
    """
    batch, inp_dim = x.shape
    out_dim = weight_t.shape[1]
    dtype = x.dtype

    # ---- lane-dense output width: pad out_dim -> multiple of 128 lanes ------
    out_p = _round_up(out_dim, 128)
    if out_p != out_dim:
        weight_t = jnp.pad(weight_t, ((0, 0), (0, out_p - out_dim)))
        bias = jnp.pad(bias, ((0, 0), (0, out_p - out_dim)))

    # ---- batch tiling: tile is a multiple of 8 sublanes, pad batch to it ----
    tb = min(block_batch, _round_up(batch, 8))
    tb = _round_up(tb, 8)
    batch_p = _round_up(batch, tb)
    if batch_p != batch:
        x = jnp.pad(x, ((0, batch_p - batch), (0, 0)))

    grid = (batch_p // tb,)

    cost = pl.CostEstimate(
        flops=2 * batch_p * inp_dim * out_p,
        transcendentals=0,
        bytes_accessed=4 * (batch_p * inp_dim + inp_dim * out_p + out_p
                            + batch_p * out_p),
    )

    mean_p = pl.pallas_call(
        _diag_gaussian_kernel,
        out_shape=jax.ShapeDtypeStruct((batch_p, out_p), dtype),
        grid=grid,
        in_specs=[
            # x: tiled over batch, full feature width.
            pl.BlockSpec((tb, inp_dim), lambda i: (i, 0)),
            # weight / bias: grid-invariant -> loaded once, stay VMEM-resident.
            pl.BlockSpec((inp_dim, out_p), lambda i: (0, 0)),
            pl.BlockSpec((1, out_p), lambda i: (0, 0)),
        ],
        out_specs=pl.BlockSpec((tb, out_p), lambda i: (i, 0)),
        compiler_params=pltpu.CompilerParams(
            # batch axis is independent -> parallel (shards across v7x's 2 TCs).
            dimension_semantics=("parallel",),
        ),
        cost_estimate=cost,
    )(x, weight_t, bias)

    mean = mean_p[:batch, :out_dim]
    # logstd path: AddBias(zeros) == logstd row; std = exp(logstd). Single tiny
    # EUP exp -> done in plain JAX, broadcast lazily by FixedNormal.
    std_row = jnp.exp(logstd)
    return mean, std_row


# ---- FixedNormal glue (plain JAX; operates on kernel outputs) --------------
class FixedNormal:
    """Diagonal Gaussian matching torch FixedNormal semantics.

    `std` may be a (1, out_dim) row; it broadcasts against `mean` lazily.
    """

    def __init__(self, mean, std):
        self.mean = mean
        self.std = std

    def log_probs(self, x):
        var = self.std ** 2
        lp = (-((x - self.mean) ** 2) / (2 * var)
              - jnp.log(self.std)
              - 0.5 * jnp.log(2.0 * jnp.pi))
        return lp.sum(-1)

    def entropy(self):
        ent = 0.5 + 0.5 * jnp.log(2.0 * jnp.pi) + jnp.log(self.std)
        ent = jnp.broadcast_to(ent, self.mean.shape)
        return ent.sum(-1)

    def mode(self):
        return self.mean


def diag_gaussian(x, weight_t, bias, logstd):
    """Full module forward: returns the FixedNormal distribution."""
    mean, std_row = diag_gaussian_forward(x, weight_t, bias, logstd)
    return FixedNormal(mean, std_row)


def make_diag_gaussian_params(key, inp_dim, out_dim, dtype=jnp.float32):
    """Deterministic init mirroring nn.Linear default + zero logstd bias."""
    kw, kb = jax.random.split(key)
    bound = 1.0 / jnp.sqrt(jnp.asarray(inp_dim, dtype))
    # PyTorch stores weight as (out, in); we keep the transpose (in, out).
    weight_t = jax.random.uniform(kw, (inp_dim, out_dim), dtype, -bound, bound)
    bias = jax.random.uniform(kb, (1, out_dim), dtype, -bound, bound)
    logstd = jnp.zeros((1, out_dim), dtype)   # AddBias(torch.zeros(out_dim))
    return weight_t, bias, logstd


if __name__ == "__main__":
    inp_dim, out_dim, batch = 32, 8, 4

    key = jax.random.PRNGKey(0)
    k_params, k_x = jax.random.split(key)
    weight_t, bias, logstd = make_diag_gaussian_params(k_params, inp_dim, out_dim)
    x = jax.random.normal(k_x, (batch, inp_dim), jnp.float32)

    mean, std_row = diag_gaussian_forward(x, weight_t, bias, logstd)
    jax.block_until_ready((mean, std_row))

    # Reference check in plain JAX (full-precision matmul reference).
    mean_ref = jnp.dot(x, weight_t, precision=jax.lax.Precision.HIGHEST) + bias
    std_ref = jnp.exp(logstd)
    assert mean.shape == (batch, out_dim)
    assert std_row.shape == (1, out_dim)
    assert jnp.allclose(mean, mean_ref, atol=1e-4, rtol=1e-4)
    assert jnp.allclose(std_row, std_ref, atol=1e-6, rtol=1e-6)

    # Exercise the distribution glue once (matches FixedNormal semantics).
    dist = FixedNormal(mean, std_row)
    full_dist = FixedNormal(mean_ref, jnp.broadcast_to(std_ref, mean_ref.shape))
    lp, ent, mode = jax.block_until_ready(
        (dist.log_probs(mean_ref), dist.entropy(), dist.mode()))
    assert jnp.allclose(lp, full_dist.log_probs(mean_ref), atol=1e-4, rtol=1e-4)
    assert jnp.allclose(ent, full_dist.entropy(), atol=1e-5, rtol=1e-5)
    # MXU-accumulated mean vs. full-precision reference: compare with tolerance.
    assert jnp.allclose(mode, full_dist.mode(), atol=1e-4, rtol=1e-4)

    print("KERNEL_OK")
</pallas_src>

<mosaic_0001>
module attributes {stable_mosaic.version = 11 : i64} {
  func.func @_diag_gaussian_kernel(%arg0: i32, %arg1: memref<8x32xf32, #tpu.memory_space<vmem>>, %arg2: memref<32x128xf32, #tpu.memory_space<vmem>>, %arg3: memref<1x128xf32, #tpu.memory_space<vmem>>, %arg4: memref<8x128xf32, #tpu.memory_space<vmem>>) attributes {dimension_semantics = [#tpu.dimension_semantics<parallel>], iteration_bounds = array<i64: 1>, scalar_prefetch = 0 : i64, scratch_operands = 0 : i64, tpu.core_type = #tpu.core_type<tc>, window_params = [{transform_indices = @transform_0, window_bounds = array<i64: 8, 32>}, {pipeline_mode = #tpu.pipeline_mode<synchronous>, transform_indices = @transform_1, window_bounds = array<i64: 32, 128>}, {pipeline_mode = #tpu.pipeline_mode<synchronous>, transform_indices = @transform_2, window_bounds = array<i64: 1, 128>}, {transform_indices = @transform_3, window_bounds = array<i64: 8, 128>}]} {
    %c0 = arith.constant 0 : index
    %c0_0 = arith.constant 0 : index
    %0 = vector.load %arg1[%c0, %c0_0] : memref<8x32xf32, #tpu.memory_space<vmem>>, vector<8x32xf32>
    %c0_1 = arith.constant 0 : index
    %c0_2 = arith.constant 0 : index
    %1 = vector.load %arg2[%c0_1, %c0_2] : memref<32x128xf32, #tpu.memory_space<vmem>>, vector<32x128xf32>
    %cst = arith.constant dense<0.000000e+00> : vector<8x128xf32>
    %2 = tpu.matmul %0, %1, %cst {dimension_numbers = #tpu.dot_dimension_numbers<[1], [0], [0], [1], [0, 0, 1, 1], [], []>} : vector<8x32xf32>, vector<32x128xf32>, vector<8x128xf32> -> vector<8x128xf32>
    %c0_3 = arith.constant 0 : index
    %c0_4 = arith.constant 0 : index
    %3 = vector.load %arg3[%c0_3, %c0_4] : memref<1x128xf32, #tpu.memory_space<vmem>>, vector<1x128xf32>
    %4 = vector.broadcast %3 : vector<1x128xf32> to vector<8x128xf32>
    %5 = arith.addf %2, %4 : vector<8x128xf32>
    %c0_5 = arith.constant 0 : index
    %c0_6 = arith.constant 0 : index
    %6 = vector.load %arg4[%c0_5, %c0_6] : memref<8x128xf32, #tpu.memory_space<vmem>>, vector<8x128xf32>
    tpu.vector_store %arg4[%c0_5, %c0_6], %5 {strides = array<i32>} : memref<8x128xf32, #tpu.memory_space<vmem>>, vector<8x128xf32>,
    return
  }
  func.func @transform_0(%arg0: i32) -> (i32, i32) {
    %c0_i32 = arith.constant 0 : i32
    %c0_i32_0 = arith.constant 0 : i32
    return %arg0, %c0_i32 : i32, i32
  }
  func.func @transform_1(%arg0: i32) -> (i32, i32) {
    %c0_i32 = arith.constant 0 : i32
    %c0_i32_0 = arith.constant 0 : i32
    %c0_i32_1 = arith.constant 0 : i32
    return %c0_i32, %c0_i32_0 : i32, i32
  }
  func.func @transform_2(%arg0: i32) -> (i32, i32) {
    %c0_i32 = arith.constant 0 : i32
    %c0_i32_0 = arith.constant 0 : i32
    %c0_i32_1 = arith.constant 0 : i32
    return %c0_i32, %c0_i32_0 : i32, i32
  }
  func.func @transform_3(%arg0: i32) -> (i32, i32) {
    %c0_i32 = arith.constant 0 : i32
    %c0_i32_0 = arith.constant 0 : i32
    return %arg0, %c0_i32 : i32, i32
  }
}

</mosaic_0001>

<bundles_post_ra>
// kernel: diag_gaussian_forward.1
= control target key start
LH: loop header
LB: loop body
LE: loop exit
PB: predicated region body
PF: predicated region fallthrough
CT: control target
= control target key end

     0   :  { %v132_v0 = vmov 0.0|0.0   ;;  %vm133_vm0 = vmmov 0   ;;  %v134_v4 = vmov 0.0   ;;  %vm26_vm1 = vcmask 261120   ;;  %s176_s1 = inlined_call_operand.vmem [shape: f32[32,128], index: 1, kind: input, shape index: {}]   ;;  %s177_s0 = inlined_call_operand.vmem [shape: f32[8,32], index: 0, kind: input, shape index: {}]   ;;  %s178_s2 = inlined_call_operand.vmem [shape: f32[1,128], index: 2, kind: input, shape index: {}]   ;;  %s179_s3 = inlined_call_operand.vmem [shape: f32[8,128], index: 3, kind: output, shape index: {}]  }
   0x1   :  { %123 = vmatprep.subr.bf16.mxu0 %v132_v0  ;;  %v15_v1 = vld [vmem:[%s176_s1] sm:$0xff]  ;;  %v16_v2 = vld [vmem:[%s176_s1 + $0x8] sm:$0xff]  ;;  %v17_v3 = vld [vmem:[%s176_s1 + $0x10] sm:$0xff]  ;;  %120 = vmatprep.mubr.msk.f32.mxu0 %vm133_vm0, %v134_v4 }
   0x2   :  { %v124_v5 = vpack.c.bf16 %v16_v2, %v15_v1  ;;  %v18_v6 = vld [vmem:[%s176_s1 + $0x18] sm:$0xff]  ;;  %v14_v8 = vld [vmem:[%s177_s0] sm:$0xff] }
   0x3   :  { %v127_v7 = vpack.c.bf16 %v18_v6, %v17_v3  ;;  %v105_v9 = vld [vmem:[%s178_s2] ss:$0 sm:$0xff] }
   0x4   :  { %125 = vmatpush3.bf16.msra.mxu0 %v124_v5 }
   0x5   :  { %126 = vmatprep.subr.bf16.mxu0 %v132_v0 }
   0x8   :  { %128 = vmatpush3.bf16.msra.mxu0 %v127_v7 }
   0xb   :  { %121 = vmatmul.mubr.msk.f32.vlgmr.msra.gmra.mrb[0].mxu0 %vm26_vm1, %v14_v8 }
  0xde   :  { %v96_v10 = vpop.f32.mrb[0].mxu0 }
  0xdf   :  { %v97_v11 = vadd.f32 %v105_v9, %v96_v10  ;;  %v122_v12 = vpop.f32.mrb[1].mxu0 }
  0xe1   :  { %100 = vst [vmem:[%s179_s3] sm:$0xff] %v97_v11 }

</bundles_post_ra>
